<compile_context>
chip_gen: v6e
topology: v6e:2x2x1
jax: 0.10.0
libtpu: 0.0.40
codegen_flags: <defaults>
</compile_context>

<pallas_src>
import math

import jax
import jax.numpy as jnp
import numpy as np
from jax.experimental import pallas as pl
from jax.experimental.pallas import tpu as pltpu

LANE = 128      # lane width / MXU column alignment
SUBLANE = 8     # f32 sublane packing
TK_MAX = 2048   # max K-tile (reduction) width
TM_MAX = 512    # max row-tile height
VMEM_BUDGET = 40 * 1024 * 1024   # target per-step footprint (limit set to 48 MiB)


def _round_up(x, m):
    return ((x + m - 1) // m) * m


def _head_kernel(x00_ref, x01_ref, x10_ref, x11_ref, w_ref, b_ref,
                 out_ref, acc_ref):
    # x??_ref : (TM, TK) f32 -- the four positions of each 2x2 pool window.
    # w_ref   : (TK, CPAD) f32, b_ref: (1, CPAD) f32
    # out_ref : (TM, CPAD), acc_ref: (TM, CPAD) f32 scratch (resident over k)
    k = pl.program_id(1)

    @pl.when(k == 0)
    def _init():
        acc_ref[...] = jnp.zeros_like(acc_ref)

    # 2x2 max pool as pure elementwise VPU ops on dense tiles.
    pooled = jnp.maximum(jnp.maximum(x00_ref[...], x01_ref[...]),
                         jnp.maximum(x10_ref[...], x11_ref[...]))
    acc_ref[...] += jnp.dot(pooled, w_ref[...],
                            preferred_element_type=jnp.float32)

    @pl.when(k == pl.num_programs(1) - 1)
    def _finish():
        out_ref[...] = (acc_ref[...] + b_ref[...]).astype(out_ref.dtype)


def basic_conv_head(x, weight, bias):
    """x: (N, C, H, W) f32; weight: (num_classes, F); bias: (num_classes,).

    Equivalent to Linear(MaxPool2d(2)(x).flatten(1)) with
    F = C * (H // 2) * (W // 2).
    """
    N, C, H, W = x.shape
    num_classes = weight.shape[0]
    h_new, w_new = H // 2, W // 2
    F = C * h_new * w_new
    assert weight.shape[1] == F, "classifier in_features must be C*(H//2)*(W//2)"

    # MaxPool2d(2) floors odd spatial dims: drop trailing row/col if odd.
    x = x[:, :, : 2 * h_new, : 2 * w_new]

    # Four strided window views, each already in PyTorch flatten order
    # (C-major, then h, then w).  XLA lowers these to strided copies.
    views = [
        x[:, :, i::2, j::2].reshape(N, F).astype(jnp.float32)
        for i in (0, 1) for j in (0, 1)
    ]

    # --- Tiling -------------------------------------------------------------
    # K-tiles: minimize padding while keeping TK <= TK_MAX and lane-aligned.
    nk = pl.cdiv(F, TK_MAX)
    tk = _round_up(pl.cdiv(F, nk), LANE)
    f_pad = nk * tk

    c_pad = _round_up(num_classes, LANE)

    # Row tile: as large as the VMEM budget allows (double-buffered inputs,
    # double-buffered output, resident accumulator), capped at TM_MAX.
    weight_bytes = 2 * tk * c_pad * 4 + 2 * c_pad * 4
    per_row_bytes = 4 * 2 * tk * 4 + 2 * c_pad * 4 + c_pad * 4
    tm_budget = max(SUBLANE, (VMEM_BUDGET - weight_bytes) // per_row_bytes)
    tm = min(TM_MAX, _round_up(N, SUBLANE), (tm_budget // SUBLANE) * SUBLANE)
    tm = max(tm, SUBLANE)
    n_pad = _round_up(N, tm)

    views = [jnp.pad(v, ((0, n_pad - N), (0, f_pad - F))) for v in views]
    w_t = jnp.pad(weight.T.astype(jnp.float32),
                  ((0, f_pad - F), (0, c_pad - num_classes)))
    b2 = jnp.pad(bias.astype(jnp.float32).reshape(1, num_classes),
                 ((0, 0), (0, c_pad - num_classes)))

    grid = (n_pad // tm, f_pad // tk)
    x_spec = pl.BlockSpec((tm, tk), lambda i, k: (i, k))

    cost = pl.CostEstimate(
        flops=2 * n_pad * f_pad * c_pad + 3 * n_pad * f_pad,
        transcendentals=0,
        bytes_accessed=(4 * n_pad * f_pad * 4            # four input views
                        + (n_pad // tm) * f_pad * c_pad * 4   # weight re-streams
                        + n_pad * c_pad * 4),             # output
    )

    out = pl.pallas_call(
        _head_kernel,
        out_shape=jax.ShapeDtypeStruct((n_pad, c_pad), jnp.float32),
        grid_spec=pltpu.PrefetchScalarGridSpec(
            num_scalar_prefetch=0,
            grid=grid,
            in_specs=[x_spec, x_spec, x_spec, x_spec,
                      pl.BlockSpec((tk, c_pad), lambda i, k: (k, 0)),   # W^T
                      pl.BlockSpec((1, c_pad), lambda i, k: (0, 0))],   # bias
            out_specs=pl.BlockSpec((tm, c_pad), lambda i, k: (i, 0)),
            scratch_shapes=[pltpu.VMEM((tm, c_pad), jnp.float32)],
        ),
        compiler_params=pltpu.CompilerParams(
            dimension_semantics=("parallel", "arbitrary"),
            vmem_limit_bytes=48 * 1024 * 1024,
        ),
        cost_estimate=cost,
    )(*views, w_t, b2)

    return out[:N, :num_classes]


def _reference_forward(x, weight, bias):
    """Pure-JAX reference of the PyTorch forward."""
    N, C, H, W = x.shape
    h_new, w_new = H // 2, W // 2
    xr = x[:, :, : 2 * h_new, : 2 * w_new].reshape(N, C, h_new, 2, w_new, 2)
    pooled = xr.max(axis=(3, 5))
    return pooled.reshape(N, -1) @ weight.T + bias


if __name__ == "__main__":
    # Shapes implied by the module: NCHW input, Linear(C*H*W//4, num_classes).
    N, C, H, W = 2, 4, 16, 16
    num_classes = 10
    F = C * (H // 2) * (W // 2)

    key = jax.random.PRNGKey(0)
    k_x, k_w, k_b = jax.random.split(key, 3)

    x = jax.random.normal(k_x, (N, C, H, W), dtype=jnp.float32)
    # nn.Linear default init: uniform(-1/sqrt(F), 1/sqrt(F))
    bound = 1.0 / math.sqrt(F)
    weight = jax.random.uniform(
        k_w, (num_classes, F), minval=-bound, maxval=bound, dtype=jnp.float32
    )
    bias = jax.random.uniform(
        k_b, (num_classes,), minval=-bound, maxval=bound, dtype=jnp.float32
    )

    out = basic_conv_head(x, weight, bias)
    out = jax.block_until_ready(out)

    ref = _reference_forward(x, weight, bias)
    assert out.shape == (N, num_classes)
    assert np.allclose(np.asarray(out), np.asarray(ref), rtol=1e-4, atol=1e-4)
    print("KERNEL_OK")
</pallas_src>

<mosaic_0001>
module attributes {stable_mosaic.version = 11 : i64} {
  func.func @_head_kernel(%arg0: i32, %arg1: i32, %arg2: memref<8x256xf32, #tpu.memory_space<vmem>>, %arg3: memref<8x256xf32, #tpu.memory_space<vmem>>, %arg4: memref<8x256xf32, #tpu.memory_space<vmem>>, %arg5: memref<8x256xf32, #tpu.memory_space<vmem>>, %arg6: memref<256x128xf32, #tpu.memory_space<vmem>>, %arg7: memref<1x128xf32, #tpu.memory_space<vmem>>, %arg8: memref<8x128xf32, #tpu.memory_space<vmem>>, %arg9: memref<8x128xf32, #tpu.memory_space<vmem>>) attributes {dimension_semantics = [#tpu.dimension_semantics<parallel>, #tpu.dimension_semantics<arbitrary>], iteration_bounds = array<i64: 1, 1>, scalar_prefetch = 0 : i64, scratch_operands = 1 : i64, tpu.core_type = #tpu.core_type<tc>, window_params = [{transform_indices = @transform_0, window_bounds = array<i64: 8, 256>}, {transform_indices = @transform_1, window_bounds = array<i64: 8, 256>}, {transform_indices = @transform_2, window_bounds = array<i64: 8, 256>}, {transform_indices = @transform_3, window_bounds = array<i64: 8, 256>}, {transform_indices = @transform_4, window_bounds = array<i64: 256, 128>}, {pipeline_mode = #tpu.pipeline_mode<synchronous>, transform_indices = @transform_5, window_bounds = array<i64: 1, 128>}, {transform_indices = @transform_6, window_bounds = array<i64: 8, 128>}]} {
    %c0_i32 = arith.constant 0 : i32
    %0 = arith.cmpi eq, %arg1, %c0_i32 : i32
    %1 = arith.extui %0 : i1 to i32
    %c0_i32_0 = arith.constant 0 : i32
    %2 = arith.cmpi ne, %1, %c0_i32_0 : i32
    scf.if %2 {
      %cst_16 = arith.constant 0.000000e+00 : f32
      %18 = vector.broadcast %cst_16 : f32 to vector<8x128xf32>
      %c0_17 = arith.constant 0 : index
      %c0_18 = arith.constant 0 : index
      %19 = vector.load %arg9[%c0_17, %c0_18] : memref<8x128xf32, #tpu.memory_space<vmem>>, vector<8x128xf32>
      tpu.vector_store %arg9[%c0_17, %c0_18], %18 {strides = array<i32>} : memref<8x128xf32, #tpu.memory_space<vmem>>, vector<8x128xf32>,
    } else {
    }
    %c0 = arith.constant 0 : index
    %c0_1 = arith.constant 0 : index
    %3 = vector.load %arg2[%c0, %c0_1] : memref<8x256xf32, #tpu.memory_space<vmem>>, vector<8x256xf32>
    %c0_2 = arith.constant 0 : index
    %c0_3 = arith.constant 0 : index
    %4 = vector.load %arg3[%c0_2, %c0_3] : memref<8x256xf32, #tpu.memory_space<vmem>>, vector<8x256xf32>
    %5 = arith.maximumf %3, %4 : vector<8x256xf32>
    %c0_4 = arith.constant 0 : index
    %c0_5 = arith.constant 0 : index
    %6 = vector.load %arg4[%c0_4, %c0_5] : memref<8x256xf32, #tpu.memory_space<vmem>>, vector<8x256xf32>
    %c0_6 = arith.constant 0 : index
    %c0_7 = arith.constant 0 : index
    %7 = vector.load %arg5[%c0_6, %c0_7] : memref<8x256xf32, #tpu.memory_space<vmem>>, vector<8x256xf32>
    %8 = arith.maximumf %6, %7 : vector<8x256xf32>
    %9 = arith.maximumf %5, %8 : vector<8x256xf32>
    %c0_8 = arith.constant 0 : index
    %c0_9 = arith.constant 0 : index
    %10 = vector.load %arg9[%c0_8, %c0_9] : memref<8x128xf32, #tpu.memory_space<vmem>>, vector<8x128xf32>
    %c0_10 = arith.constant 0 : index
    %c0_11 = arith.constant 0 : index
    %11 = vector.load %arg6[%c0_10, %c0_11] : memref<256x128xf32, #tpu.memory_space<vmem>>, vector<256x128xf32>
    %cst = arith.constant dense<0.000000e+00> : vector<8x128xf32>
    %12 = tpu.matmul %9, %11, %cst {dimension_numbers = #tpu.dot_dimension_numbers<[1], [0], [0], [1], [0, 0, 1, 1], [], []>} : vector<8x256xf32>, vector<256x128xf32>, vector<8x128xf32> -> vector<8x128xf32>
    %13 = arith.addf %10, %12 : vector<8x128xf32>
    %c0_12 = arith.constant 0 : index
    %c0_13 = arith.constant 0 : index
    %14 = vector.load %arg9[%c0_12, %c0_13] : memref<8x128xf32, #tpu.memory_space<vmem>>, vector<8x128xf32>
    tpu.vector_store %arg9[%c0_12, %c0_13], %13 {strides = array<i32>} : memref<8x128xf32, #tpu.memory_space<vmem>>, vector<8x128xf32>,
    %c0_i32_14 = arith.constant 0 : i32
    %15 = arith.cmpi eq, %arg1, %c0_i32_14 : i32
    %16 = arith.extui %15 : i1 to i32
    %c0_i32_15 = arith.constant 0 : i32
    %17 = arith.cmpi ne, %16, %c0_i32_15 : i32
    scf.if %17 {
      %c0_16 = arith.constant 0 : index
      %c0_17 = arith.constant 0 : index
      %18 = vector.load %arg9[%c0_16, %c0_17] : memref<8x128xf32, #tpu.memory_space<vmem>>, vector<8x128xf32>
      %c0_18 = arith.constant 0 : index
      %c0_19 = arith.constant 0 : index
      %19 = vector.load %arg7[%c0_18, %c0_19] : memref<1x128xf32, #tpu.memory_space<vmem>>, vector<1x128xf32>
      %20 = vector.broadcast %19 : vector<1x128xf32> to vector<8x128xf32>
      %21 = arith.addf %18, %20 : vector<8x128xf32>
      %c0_20 = arith.constant 0 : index
      %c0_21 = arith.constant 0 : index
      %22 = vector.load %arg8[%c0_20, %c0_21] : memref<8x128xf32, #tpu.memory_space<vmem>>, vector<8x128xf32>
      tpu.vector_store %arg8[%c0_20, %c0_21], %21 {strides = array<i32>} : memref<8x128xf32, #tpu.memory_space<vmem>>, vector<8x128xf32>,
    } else {
    }
    return
  }
  func.func @transform_0(%arg0: i32, %arg1: i32) -> (i32, i32) {
    %c0_i32 = arith.constant 0 : i32
    return %arg0, %arg1 : i32, i32
  }
  func.func @transform_1(%arg0: i32, %arg1: i32) -> (i32, i32) {
    %c0_i32 = arith.constant 0 : i32
    return %arg0, %arg1 : i32, i32
  }
  func.func @transform_2(%arg0: i32, %arg1: i32) -> (i32, i32) {
    %c0_i32 = arith.constant 0 : i32
    return %arg0, %arg1 : i32, i32
  }
  func.func @transform_3(%arg0: i32, %arg1: i32) -> (i32, i32) {
    %c0_i32 = arith.constant 0 : i32
    return %arg0, %arg1 : i32, i32
  }
  func.func @transform_4(%arg0: i32, %arg1: i32) -> (i32, i32) {
    %c0_i32 = arith.constant 0 : i32
    %c0_i32_0 = arith.constant 0 : i32
    return %arg1, %c0_i32 : i32, i32
  }
  func.func @transform_5(%arg0: i32, %arg1: i32) -> (i32, i32) {
    %c0_i32 = arith.constant 0 : i32
    %c0_i32_0 = arith.constant 0 : i32
    %c0_i32_1 = arith.constant 0 : i32
    return %c0_i32, %c0_i32_0 : i32, i32
  }
  func.func @transform_6(%arg0: i32, %arg1: i32) -> (i32, i32) {
    %c0_i32 = arith.constant 0 : i32
    %c0_i32_0 = arith.constant 0 : i32
    return %arg0, %c0_i32 : i32, i32
  }
}

</mosaic_0001>

<bundles_post_ra>
// kernel: tpu_custom_call.1
= control target key start
LH: loop header
LB: loop body
LE: loop exit
PB: predicated region body
PF: predicated region fallthrough
CT: control target
= control target key end

     0   :  { %11 = vsyncpa [#allocation4], 0  ;;  %s474_s0 = inlined_call_operand.hbm [shape: f32[8,256], index: 0, kind: input, shape index: {}]   ;;  %s475_s1 = inlined_call_operand.hbm [shape: f32[8,256], index: 1, kind: input, shape index: {}]   ;;  %s476_s2 = inlined_call_operand.hbm [shape: f32[8,256], index: 2, kind: input, shape index: {}]   ;;  %s477_s3 = inlined_call_operand.hbm [shape: f32[8,256], index: 3, kind: input, shape index: {}]   ;;  %s478_s4 = inlined_call_operand.hbm [shape: f32[256,128], index: 4, kind: input, shape index: {}]   ;;  %s479_s5 = inlined_call_operand.vmem [shape: f32[1,128], index: 5, kind: input, shape index: {}]   ;;  %s480_s6 = inlined_call_operand.hbm [shape: f32[8,128], index: 6, kind: output, shape index: {}]  }
   0x1   :  { %12 = vsyncpa [#allocation7], 0 }
   0x2   :  { %13 = vsyncpa [#allocation10], 0 }
   0x3   :  { %14 = vsyncpa [#allocation5], 0  ;;  %s410_s21 = smov [#allocation6]   ;;  %s411_s23 = smov [#allocation9]  }
   0x4   :  { %s31_s22 = sshll.u32 %s410_s21, 4  ;;  %s51_s24 = sshll.u32 %s411_s23, 4  ;;  %s32_s22 = int_to_ptr.vmem [resolvable:$true] %s31_s22  ;;  %s52_s24 = int_to_ptr.vmem [resolvable:$true] %s51_s24 }
   0x5   :  { %s290_s25 = scalar_lea.vmem %s32_s22, 256  ;;  %p295_p1 = scmp.lt.s32.totalorder %s32_s22, %s32_s22 }
   0x6   :  { %p291_p0 = scmp.ne.s32.totalorder %s32_s22, %s290_s25  ;;  %p296_p2 = scmp.lt.s32.totalorder %s290_s25, %s290_s25 }
   0x8   :  { %p297_p3 = por %p296_p2, %p295_p1 }
   0xa   :  { %p298_p4 = pnand %p297_p3, %p291_p0 }
   0xc   :  { %301 = shalt.err (!%p298_p4)
}
   0xd   :  { %34 = dma.hbm_to_vmem [thread:$0]  %s475_s1, 256, %s32_s22, [#allocation7]  }
   0xe   :  { %s310_s28 = scalar_lea.vmem %s52_s24, 256  ;;  %p315_p6 = scmp.lt.s32.totalorder %s52_s24, %s52_s24 }
   0xf   :  { %p311_p5 = scmp.ne.s32.totalorder %s52_s24, %s310_s28  ;;  %p316_p7 = scmp.lt.s32.totalorder %s310_s28, %s310_s28 }
  0x11   :  { %p317_p8 = por %p316_p7, %p315_p6 }
  0x13   :  { %p318_p9 = pnand %p317_p8, %p311_p5 }
  0x15   :  { %321 = shalt.err (!%p318_p9)
}
  0x16   :  { %54 = dma.hbm_to_vmem [thread:$0]  %s477_s3, 256, %s52_s24, [#allocation10]  }
  0x17   :  { %s412_s7 = smov [#allocation3]   ;;  %s413_s9 = smov [#allocation8]  }
  0x18   :  { %s21_s8 = sshll.u32 %s412_s7, 4  ;;  %s41_s10 = sshll.u32 %s413_s9, 4  ;;  %s22_s8 = int_to_ptr.vmem [resolvable:$true] %s21_s8  ;;  %s42_s10 = int_to_ptr.vmem [resolvable:$true] %s41_s10 }
  0x19   :  { %s330_s11 = scalar_lea.vmem %s22_s8, 256  ;;  %p335_p11 = scmp.lt.s32.totalorder %s22_s8, %s22_s8 }
  0x1a   :  { %p331_p10 = scmp.ne.s32.totalorder %s22_s8, %s330_s11  ;;  %p336_p12 = scmp.lt.s32.totalorder %s330_s11, %s330_s11 }
  0x1c   :  { %p337_p13 = por %p336_p12, %p335_p11 }
  0x1e   :  { %p338_p0 = pnand %p337_p13, %p331_p10 }
  0x20   :  { %341 = shalt.err (!%p338_p0)
}
  0x21   :  { %24 = dma.hbm_to_vmem [thread:$0]  %s474_s0, 256, %s22_s8, [#allocation4]  }
  0x22   :  { %s350_s13 = scalar_lea.vmem %s42_s10, 256  ;;  %p355_p2 = scmp.lt.s32.totalorder %s42_s10, %s42_s10 }
  0x23   :  { %p351_p1 = scmp.ne.s32.totalorder %s42_s10, %s350_s13  ;;  %p356_p3 = scmp.lt.s32.totalorder %s350_s13, %s350_s13 }
  0x25   :  { %p357_p4 = por %p356_p3, %p355_p2 }
  0x27   :  { %p358_p5 = pnand %p357_p4, %p351_p1 }
  0x29   :  { %361 = shalt.err (!%p358_p5)
}
  0x2a   :  { %44 = dma.hbm_to_vmem [thread:$0]  %s476_s2, 256, %s42_s10, [#allocation7]  }
  0x2b   :  { %s414_s15 = smov [#allocation11]  }
  0x2c   :  { %s60_s16 = sshll.u32 %s414_s15, 4  ;;  %s61_s16 = int_to_ptr.vmem [resolvable:$true] %s60_s16 }
  0x2d   :  { %s370_s17 = scalar_lea.vmem %s61_s16, 4096  ;;  %p375_p7 = scmp.lt.s32.totalorder %s61_s16, %s61_s16 }
  0x2e   :  { %p371_p6 = scmp.ne.s32.totalorder %s61_s16, %s370_s17  ;;  %p376_p8 = scmp.lt.s32.totalorder %s370_s17, %s370_s17 }
  0x30   :  { %p377_p9 = por %p376_p8, %p375_p7 }
  0x32   :  { %p378_p10 = pnand %p377_p9, %p371_p6 }
  0x34   :  { %381 = shalt.err (!%p378_p10)
}
  0x35   :  { %s415_s0 = smov 128   ;;  %s416_s18 = smov 8  }
  0x36   :  { %66 = dma.hbm_to_vmem [thread:$0]  %s478_s4, 4096, %s61_s16, [#allocation10], %s415_s0, %s415_s0, %s416_s18  }
  0x37   :  { %402 = dma.done.wait [#allocation4], 256  }
  0x38   :  { %403 = vsyncadd [#allocation4], 4294967040 }
  0x39   :  { %404 = dma.done.wait [#allocation7], 512  }
  0x3a   :  { %405 = vsyncadd [#allocation7], 4294966784 }
  0x3b   :  { %406 = dma.done.wait [#allocation10], 4352  }
  0x3c   :  { %407 = vsyncadd [#allocation10], 4294962944  ;;  %v135_v0 = vld [vmem:[#allocation11 + $0xf8] sm:$0xff]  ;;  %v134_v2 = vld [vmem:[#allocation11 + $0xf0] sm:$0xff]  ;;  %s417_s21 = smov [#allocation12]  }
  0x3d   :  { %v119_v1 = vld [vmem:[#allocation11 + $0x78] sm:$0xff]  ;;  %239 = vmatprep.subr.mxu0 %v135_v0  ;;  %v118_v3 = vld [vmem:[#allocation11 + $0x70] sm:$0xff]  ;;  %v133_v4 = vld [vmem:[#allocation11 + $0xe8] sm:$0xff]  ;;  %s227_s22 = sshll.u32 %s417_s21, 4  ;;  %s228_s22 = int_to_ptr.vmem [resolvable:$true] %s227_s22 }
  0x3e   :  { %240 = vmatpush3.msra.mxu0 %v119_v1  ;;  %v117_v5 = vld [vmem:[#allocation11 + $0x68] sm:$0xff]  ;;  %v132_v6 = vld [vmem:[#allocation11 + $0xe0] sm:$0xff]  ;;  %v131_v8 = vld [vmem:[#allocation11 + $0xd8] sm:$0xff]  ;;  %s382_s23 = scalar_lea.vmem %s228_s22, 128  ;;  %p387_p12 = scmp.lt.s32.totalorder %s228_s22, %s228_s22 }
  0x3f   :  { %241 = vmatprep.subr.mxu0 %v134_v2  ;;  %v116_v7 = vld [vmem:[#allocation11 + $0x60] sm:$0xff]  ;;  %v115_v9 = vld [vmem:[#allocation11 + $0x58] sm:$0xff]  ;;  %v130_v10 = vld [vmem:[#allocation11 + $0xd0] sm:$0xff]  ;;  %p383_p11 = scmp.ne.s32.totalorder %s228_s22, %s382_s23  ;;  %p388_p13 = scmp.lt.s32.totalorder %s382_s23, %s382_s23 }
  0x40   :  { %242 = vmatpush3.msra.mxu0 %v118_v3  ;;  %v114_v11 = vld [vmem:[#allocation11 + $0x50] sm:$0xff]  ;;  %v129_v12 = vld [vmem:[#allocation11 + $0xc8] sm:$0xff]  ;;  %v92_v15 = vld [vmem:[#allocation6 + $0x8] sm:$0xff] }
  0x41   :  { %243 = vmatprep.subr.mxu0 %v133_v4  ;;  %v113_v13 = vld [vmem:[#allocation11 + $0x48] sm:$0xff]  ;;  %v98_v17 = vld [vmem:[#allocation9 + $0x8] sm:$0xff]  ;;  %v128_v18 = vld [vmem:[#allocation11 + $0xc0] sm:$0xff]  ;;  %p389_p0 = por %p388_p13, %p387_p12 }
  0x42   :  { %244 = vmatpush3.msra.mxu0 %v117_v5  ;;  %v90_v14 = vld [vmem:[#allocation3 + $0x8] sm:$0xff]  ;;  %v112_v21 = vld [vmem:[#allocation11 + $0x40] sm:$0xff]  ;;  %v127_v22 = vld [vmem:[#allocation11 + $0xb8] sm:$0xff] }
  0x43   :  { %245 = vmatprep.subr.mxu0 %v132_v6  ;;  %v96_v16 = vld [vmem:[#allocation8 + $0x8] sm:$0xff]  ;;  %v94_v19 = vmax.f32 %v90_v14, %v92_v15  ;;  %v111_v24 = vld [vmem:[#allocation11 + $0x38] sm:$0xff]  ;;  %v126_v25 = vld [vmem:[#allocation11 + $0xb0] sm:$0xff]  ;;  %p390_p1 = pnand %p389_p0, %p383_p11 }
  0x44   :  { %246 = vmatpush3.msra.mxu0 %v116_v7  ;;  %v100_v20 = vmax.f32 %v96_v16, %v98_v17  ;;  %v110_v26 = vld [vmem:[#allocation11 + $0x30] sm:$0xff]  ;;  %v125_v27 = vld [vmem:[#allocation11 + $0xa8] sm:$0xff]  ;;  %v124_v29 = vld [vmem:[#allocation11 + $0xa0] sm:$0xff] }
  0x45   :  { %247 = vmatprep.subr.mxu0 %v131_v8  ;;  %v109_v28 = vld [vmem:[#allocation11 + $0x28] sm:$0xff]  ;;  %v108_v30 = vld [vmem:[#allocation11 + $0x20] sm:$0xff]  ;;  %v123_v31 = vld [vmem:[#allocation11 + $0x98] sm:$0xff] }
  0x46   :  { %248 = vmatpush3.msra.mxu0 %v115_v9  ;;  %v102_v23 = vmax.f32 %v94_v19, %v100_v20  ;;  %v89_v32 = vld [vmem:[#allocation3] sm:$0xff]  ;;  %v91_v33 = vld [vmem:[#allocation6] sm:$0xff]  ;;  %v107_v36 = vld [vmem:[#allocation11 + $0x18] sm:$0xff] }
  0x47   :  { %249 = vmatprep.subr.mxu0 %v130_v10  ;;  %v95_v34 = vld [vmem:[#allocation8] sm:$0xff]  ;;  %v97_v35 = vld [vmem:[#allocation9] sm:$0xff]  ;;  %v93_v39 = vmax.f32 %v89_v32, %v91_v33  ;;  %v121_v41 = vld [vmem:[#allocation11 + $0x88] sm:$0xff] }
  0x48   :  { %250 = vmatpush3.msra.mxu0 %v114_v11  ;;  %200 = vmatprep.mubr.f32.mxu0 %v102_v23  ;;  %v122_v37 = vld [vmem:[#allocation11 + $0x90] sm:$0xff]  ;;  %v99_v40 = vmax.f32 %v95_v34, %v97_v35  ;;  %v105_v42 = vld [vmem:[#allocation11 + $0x8] sm:$0xff]  ;;  %v120_v43 = vld [vmem:[#allocation11 + $0x80] sm:$0xff] }
  0x49   :  { %251 = vmatprep.subr.mxu0 %v129_v12  ;;  %v106_v38 = vld [vmem:[#allocation11 + $0x10] sm:$0xff]  ;;  %v104_v44 = vld [vmem:[#allocation11] sm:$0xff] }
  0x4a   :  { %252 = vmatpush3.msra.mxu0 %v113_v13  ;;  %v101_v45 = vmax.f32 %v93_v39, %v99_v40  ;;  %v238_v48 = vld [vmem:[%s479_s5] ss:$0 sm:$0xff] }
  0x4b   :  { %253 = vmatprep.subr.mxu0 %v128_v18 }
  0x4c   :  { %254 = vmatpush3.msra.mxu0 %v112_v21 }
  0x4d   :  { %255 = vmatprep.subr.mxu0 %v127_v22 }
  0x4e   :  { %256 = vmatpush3.msra.mxu0 %v111_v24 }
  0x4f   :  { %257 = vmatprep.subr.mxu0 %v126_v25 }
  0x50   :  { %258 = vmatpush3.msra.mxu0 %v110_v26 }
  0x51   :  { %259 = vmatprep.subr.mxu0 %v125_v27 }
  0x52   :  { %260 = vmatpush3.msra.mxu0 %v109_v28 }
  0x53   :  { %261 = vmatprep.subr.mxu0 %v124_v29 }
  0x54   :  { %262 = vmatpush3.msra.mxu0 %v108_v30 }
  0x55   :  { %263 = vmatprep.subr.mxu0 %v123_v31 }
  0x56   :  { %264 = vmatpush3.msra.mxu0 %v107_v36 }
  0x57   :  { %265 = vmatprep.subr.mxu0 %v122_v37 }
  0x58   :  { %266 = vmatpush3.msra.mxu0 %v106_v38 }
  0x59   :  { %267 = vmatprep.subr.mxu0 %v121_v41 }
  0x5a   :  { %268 = vmatpush3.msra.mxu0 %v105_v42 }
  0x5b   :  { %269 = vmatprep.subr.mxu0 %v120_v43 }
  0x5c   :  { %270 = vmatpush3.msra.mxu0 %v104_v44 }
  0x5d   :  { %201 = vmatmul.mubr.f32.vlgmr.msra.gmra.mxu0 %v101_v45 }
 0x11d   :  { %v271_v46 = vpop.f32.mrf.mxu0 }
 0x11f   :  { %v272_v47 = vpop.f32.mrf.mxu0 }
 0x120   :  { %v273_v49 = vadd.f32 %v272_v47, %v271_v46 }
 0x122   :  { %v219_v50 = vadd.f32 %v273_v49, %v238_v48 }
 0x124   :  { %220 = vst [vmem:[#allocation12] sm:$0xff] %v219_v50 }
 0x125   :  { %393 = shalt.err (!%p390_p1)
}
 0x126   :  { %230 = dma.vmem_to_hbm [thread:$0]  %s228_s22, 128, %s480_s6, [#allocation5]  }
 0x127   :  { %408 = dma.done.wait [#allocation5], 128  }
 0x128   :  { %409 = vsyncadd [#allocation5], 4294967168 }
 0x129   :  { %234 = vsyncpa [#allocation4], 1 }
 0x12a   :  { %235 = vsyncpa [#allocation7], 1 }
 0x12b   :  { %236 = vsyncpa [#allocation10], 1 }
 0x12c   :  { %237 = vsyncpa [#allocation5], 1 }

</bundles_post_ra>
